<compile_context>
chip_gen: v7x
topology: tpu7x:2x2x1
jax: 0.10.0
libtpu: 0.0.40
codegen_flags: <defaults>
</compile_context>

<pallas_src>
import functools

import jax
import jax.numpy as jnp
from jax import lax
from jax.experimental import pallas as pl
from jax.experimental.pallas import tpu as pltpu

BN_EPS = 1e-5
MM_DTYPE = jnp.bfloat16          # MXU operand dtype (accumulation stays f32)
PIX_TILE = 2048                  # pixels per grid step in kernel 1
VMEM_K1 = 32 * 1024 * 1024       # kernel 1 needs only a few MiB; 32 is ample
VMEM_K2 = 48 * 1024 * 1024       # safe on v7x (64 MiB physical), fine elsewhere


# ---------------------------------------------------------------------------
# Kernel 1:  y1 = w1 @ relu(x * scale1 + shift1)   (1x1 conv, channel-major)
#            + fused per-channel partial sums for BN2 statistics
# ---------------------------------------------------------------------------
def _bn_relu_conv1_kernel(x_ref, scale_ref, shift_ref, w_ref,
                          y_ref, s_ref, ss_ref, *, hw, tp):
    # grid = (N, num_pixel_tiles); pixel axis accumulates the BN2 stats.
    @pl.when(pl.program_id(1) == 0)
    def _():
        s_ref[...] = jnp.zeros_like(s_ref)
        ss_ref[...] = jnp.zeros_like(ss_ref)

    p0 = pl.program_id(1) * tp
    lane = lax.broadcasted_iota(jnp.int32, (1, tp), 1) + p0
    valid = lane < hw                                   # mask padded last tile

    x = jnp.where(valid, x_ref[0], 0.0)                 # (Cin, tp) f32
    t = jnp.maximum(x * scale_ref[...] + shift_ref[...], 0.0)   # f32 BN+ReLU
    y = jnp.dot(w_ref[...], t.astype(w_ref.dtype),      # (C4, tp), f32 accum
                preferred_element_type=jnp.float32)
    y = jnp.where(valid, y, 0.0)

    y_ref[0] = y.astype(y_ref.dtype)                    # bf16 writeback
    s_ref[0] += jnp.sum(y, axis=1, keepdims=True)       # f32-accurate stats
    ss_ref[0] += jnp.sum(y * y, axis=1, keepdims=True)


# ---------------------------------------------------------------------------
# Kernel 2:  out = concat(conv3x3(relu(y1*scale2+shift2)), x)   per image,
#            channel-major, zero-bordered VMEM scratch + Ref-view taps
# ---------------------------------------------------------------------------
def _bn_relu_conv3_concat_kernel(y_ref, x_ref, scale_ref, shift_ref, w_ref,
                                 o_ref, pad_ref, *, H, W, C4, G):
    P = H * W
    PAD = W + 1            # flat-index pad covers all vertical out-of-bounds

    # Zero the borders of the scratch once; the interior is rewritten each step.
    @pl.when(pl.program_id(0) == 0)
    def _():
        pad_ref[:, :PAD] = jnp.zeros((C4, PAD), pad_ref.dtype)
        pad_ref[:, PAD + P:] = jnp.zeros((C4, PAD), pad_ref.dtype)

    # BN2 affine + ReLU in f32 (v5e has no bf16 VPU), bf16 operands for MXU.
    t2 = jnp.maximum(y_ref[0].astype(jnp.float32) * scale_ref[...]
                     + shift_ref[...], 0.0)
    pad_ref[:, PAD:PAD + P] = t2.astype(pad_ref.dtype)

    # Horizontal-edge masks (vertical edges are covered by the zero border).
    col = lax.broadcasted_iota(jnp.int32, (1, P), 1) % W
    not_left = col != 0
    not_right = col != (W - 1)

    def tap(kh, kw):
        d = (kh - 1) * W + (kw - 1)
        slab = pad_ref[:, PAD + d:PAD + d + P]           # static Ref slice
        if kw == 0:
            slab = jnp.where(not_left, slab, jnp.zeros_like(slab))
        elif kw == 2:
            slab = jnp.where(not_right, slab, jnp.zeros_like(slab))
        return slab

    taps = [(kh, kw) for kh in range(3) for kw in range(3)]
    if C4 < 128:
        # Small C4: one big-K im2col dot (K = 9*C4) to fill the MXU K dim.
        colmat = jnp.concatenate([tap(kh, kw) for kh, kw in taps], axis=0)
        conv = jnp.dot(w_ref[...], colmat, preferred_element_type=jnp.float32)
    else:
        # Large C4: MXU K already full per tap; 9 accumulated dots, no col.
        conv = jnp.zeros((G, P), jnp.float32)
        for ti, (kh, kw) in enumerate(taps):
            conv += jnp.dot(w_ref[:, ti * C4:(ti + 1) * C4], tap(kh, kw),
                            preferred_element_type=jnp.float32)

    # Fused torch.cat([out, x], dim=1): two lane-dense Ref stores.
    o_ref[0, :G, :] = conv.astype(o_ref.dtype)
    o_ref[0, G:, :] = x_ref[0].astype(o_ref.dtype)


# ---------------------------------------------------------------------------
# Wrapper (NCHW in / NCHW out, like the PyTorch module)
# ---------------------------------------------------------------------------
@jax.jit
def bottleneck_forward(x_nchw, params):
    g1, b1, w1_oihw, g2, b2, w2_oihw = params
    N, Cin, H, W = x_nchw.shape
    C4 = w1_oihw.shape[0]
    G = w2_oihw.shape[0]
    Cout = G + Cin
    HW = H * W
    cnt = jnp.float32(N * HW)

    # NCHW-native: only free reshapes, no transposes of the activation.
    x_flat = x_nchw.reshape(N, Cin, HW).astype(jnp.float32)
    w1 = w1_oihw[:, :, 0, 0].astype(MM_DTYPE)                            # (C4, Cin)
    w2 = jnp.transpose(w2_oihw, (0, 2, 3, 1)).reshape(G, 9 * C4).astype(MM_DTYPE)

    # ---- BN1 batch stats (training mode, biased var), single pass over x ----
    mu1 = jnp.mean(x_flat, axis=(0, 2))
    var1 = jnp.maximum(jnp.mean(jnp.square(x_flat), axis=(0, 2)) - mu1 * mu1, 0.0)
    inv1 = lax.rsqrt(var1 + BN_EPS)
    scale1 = (g1 * inv1).reshape(Cin, 1)
    shift1 = (b1 - mu1 * g1 * inv1).reshape(Cin, 1)

    tp = min(PIX_TILE, HW)
    n_pt = pl.cdiv(HW, tp)

    y1, psum, psumsq = pl.pallas_call(
        functools.partial(_bn_relu_conv1_kernel, hw=HW, tp=tp),
        out_shape=(
            jax.ShapeDtypeStruct((N, C4, HW), MM_DTYPE),       # y1 (bf16)
            jax.ShapeDtypeStruct((N, C4, 1), jnp.float32),     # sum(y1)
            jax.ShapeDtypeStruct((N, C4, 1), jnp.float32),     # sum(y1^2)
        ),
        grid=(N, n_pt),
        in_specs=[
            pl.BlockSpec((1, Cin, tp), lambda n, p: (n, 0, p)),
            pl.BlockSpec((Cin, 1), lambda n, p: (0, 0)),
            pl.BlockSpec((Cin, 1), lambda n, p: (0, 0)),
            pl.BlockSpec((C4, Cin), lambda n, p: (0, 0)),
        ],
        out_specs=(
            pl.BlockSpec((1, C4, tp), lambda n, p: (n, 0, p)),
            pl.BlockSpec((1, C4, 1), lambda n, p: (n, 0, 0)),
            pl.BlockSpec((1, C4, 1), lambda n, p: (n, 0, 0)),
        ),
        compiler_params=pltpu.CompilerParams(
            dimension_semantics=("parallel", "arbitrary"),
            vmem_limit_bytes=VMEM_K1),
    )(x_flat, scale1, shift1, w1)

    # ---- BN2 batch stats from fused partial sums (no extra HBM pass on y1) ---
    mu2 = jnp.sum(psum, axis=0)[:, 0] / cnt
    ey2 = jnp.sum(psumsq, axis=0)[:, 0] / cnt
    var2 = jnp.maximum(ey2 - mu2 * mu2, 0.0)
    inv2 = lax.rsqrt(var2 + BN_EPS)
    scale2 = (g2 * inv2).reshape(C4, 1)
    shift2 = (b2 - mu2 * g2 * inv2).reshape(C4, 1)

    out_flat = pl.pallas_call(
        functools.partial(_bn_relu_conv3_concat_kernel, H=H, W=W, C4=C4, G=G),
        out_shape=jax.ShapeDtypeStruct((N, Cout, HW), jnp.float32),
        grid=(N,),
        in_specs=[
            pl.BlockSpec((1, C4, HW), lambda n: (n, 0, 0)),
            pl.BlockSpec((1, Cin, HW), lambda n: (n, 0, 0)),
            pl.BlockSpec((C4, 1), lambda n: (0, 0)),
            pl.BlockSpec((C4, 1), lambda n: (0, 0)),
            pl.BlockSpec((G, 9 * C4), lambda n: (0, 0)),
        ],
        out_specs=pl.BlockSpec((1, Cout, HW), lambda n: (n, 0, 0)),
        scratch_shapes=[pltpu.VMEM((C4, HW + 2 * (W + 1)), MM_DTYPE)],
        compiler_params=pltpu.CompilerParams(
            dimension_semantics=("parallel",),
            vmem_limit_bytes=VMEM_K2),
    )(y1, x_flat, scale2, shift2, w2)

    return out_flat.reshape(N, Cout, H, W)


# ---------------------------------------------------------------------------
# Pure-JAX reference (NCHW) mirroring the PyTorch training-mode forward
# ---------------------------------------------------------------------------
def reference_forward(x, params, eps=BN_EPS):
    g1, b1, w1, g2, b2, w2 = params

    def bn_relu(v, g, b):
        mu = v.mean(axis=(0, 2, 3), keepdims=True)
        var = ((v - mu) ** 2).mean(axis=(0, 2, 3), keepdims=True)
        y = (v - mu) * lax.rsqrt(var + eps) * g.reshape(1, -1, 1, 1) \
            + b.reshape(1, -1, 1, 1)
        return jnp.maximum(y, 0.0)

    dn = ('NCHW', 'OIHW', 'NCHW')
    t = bn_relu(x, g1, b1)
    y = lax.conv_general_dilated(t, w1, (1, 1), 'VALID', dimension_numbers=dn,
                                 precision=lax.Precision.HIGHEST)
    t2 = bn_relu(y, g2, b2)
    y2 = lax.conv_general_dilated(t2, w2, (1, 1), ((1, 1), (1, 1)),
                                  dimension_numbers=dn,
                                  precision=lax.Precision.HIGHEST)
    return jnp.concatenate([y2, x], axis=1)


def init_params(key, in_planes, growth_rate):
    C4 = 4 * growth_rate
    k = jax.random.split(key, 6)
    g1 = 1.0 + 0.1 * jax.random.normal(k[0], (in_planes,), jnp.float32)
    b1 = 0.1 * jax.random.normal(k[1], (in_planes,), jnp.float32)
    w1 = 0.2 * jax.random.normal(k[2], (C4, in_planes, 1, 1), jnp.float32)
    g2 = 1.0 + 0.1 * jax.random.normal(k[3], (C4,), jnp.float32)
    b2 = 0.1 * jax.random.normal(k[4], (C4,), jnp.float32)
    w2 = 0.1 * jax.random.normal(k[5], (growth_rate, C4, 3, 3), jnp.float32)
    return (g1, b1, w1, g2, b2, w2)


if __name__ == "__main__":
    in_planes, growth_rate = 4, 8           # C4 = 32, out channels = 8 + 4 = 12
    N, H, W = 2, 16, 16

    key = jax.random.PRNGKey(0)
    kx, kp = jax.random.split(key)
    x = jax.random.normal(kx, (N, in_planes, H, W), jnp.float32)
    params = init_params(kp, in_planes, growth_rate)

    out = jax.block_until_ready(bottleneck_forward(x, params))
    ref = jax.block_until_ready(reference_forward(x, params))

    assert out.shape == (N, growth_rate + in_planes, H, W), out.shape
    max_err = float(jnp.max(jnp.abs(out - ref)))
    # bf16 MXU operands + bf16 y1 storage (f32 accumulation & f32 BN stats)
    assert jnp.allclose(out, ref, rtol=2e-2, atol=5e-2), max_err

    print("KERNEL_OK")
</pallas_src>

<mosaic_0001>
module attributes {stable_mosaic.version = 11 : i64} {
  func.func @_bn_relu_conv1_kernel(%arg0: i32, %arg1: i32, %arg2: memref<1x4x256xf32, #tpu.memory_space<vmem>>, %arg3: memref<4x1xf32, #tpu.memory_space<vmem>>, %arg4: memref<4x1xf32, #tpu.memory_space<vmem>>, %arg5: memref<32x4xbf16, #tpu.memory_space<vmem>>, %arg6: memref<1x32x256xbf16, #tpu.memory_space<vmem>>, %arg7: memref<1x32x1xf32, #tpu.memory_space<vmem>>, %arg8: memref<1x32x1xf32, #tpu.memory_space<vmem>>) attributes {dimension_semantics = [#tpu.dimension_semantics<parallel>, #tpu.dimension_semantics<arbitrary>], iteration_bounds = array<i64: 2, 1>, scalar_prefetch = 0 : i64, scratch_operands = 0 : i64, tpu.core_type = #tpu.core_type<tc>, window_params = [{transform_indices = @transform_0, window_bounds = array<i64: 1, 4, 256>}, {pipeline_mode = #tpu.pipeline_mode<synchronous>, transform_indices = @transform_1, window_bounds = array<i64: 4, 1>}, {pipeline_mode = #tpu.pipeline_mode<synchronous>, transform_indices = @transform_2, window_bounds = array<i64: 4, 1>}, {pipeline_mode = #tpu.pipeline_mode<synchronous>, transform_indices = @transform_3, window_bounds = array<i64: 32, 4>}, {transform_indices = @transform_4, window_bounds = array<i64: 1, 32, 256>}, {transform_indices = @transform_5, window_bounds = array<i64: 1, 32, 1>}, {transform_indices = @transform_6, window_bounds = array<i64: 1, 32, 1>}]} {
    %c0_i32 = arith.constant 0 : i32
    %0 = arith.cmpi eq, %arg1, %c0_i32 : i32
    %1 = arith.extui %0 : i1 to i32
    %c0_i32_0 = arith.constant 0 : i32
    %2 = arith.cmpi ne, %1, %c0_i32_0 : i32
    scf.if %2 {
      %cst_30 = arith.constant 0.000000e+00 : f32
      %51 = vector.broadcast %cst_30 : f32 to vector<1x32x1xf32>
      %c0_31 = arith.constant 0 : index
      %c0_32 = arith.constant 0 : index
      %c0_33 = arith.constant 0 : index
      %52 = vector.load %arg7[%c0_31, %c0_32, %c0_33] : memref<1x32x1xf32, #tpu.memory_space<vmem>>, vector<1x32x1xf32>
      tpu.vector_store %arg7[%c0_31, %c0_32, %c0_33], %51 {strides = array<i32>} : memref<1x32x1xf32, #tpu.memory_space<vmem>>, vector<1x32x1xf32>,
      %cst_34 = arith.constant 0.000000e+00 : f32
      %53 = vector.broadcast %cst_34 : f32 to vector<1x32x1xf32>
      %c0_35 = arith.constant 0 : index
      %c0_36 = arith.constant 0 : index
      %c0_37 = arith.constant 0 : index
      %54 = vector.load %arg8[%c0_35, %c0_36, %c0_37] : memref<1x32x1xf32, #tpu.memory_space<vmem>>, vector<1x32x1xf32>
      tpu.vector_store %arg8[%c0_35, %c0_36, %c0_37], %53 {strides = array<i32>} : memref<1x32x1xf32, #tpu.memory_space<vmem>>, vector<1x32x1xf32>,
    } else {
    }
    %c256_i32 = arith.constant 256 : i32
    %3 = arith.muli %arg1, %c256_i32 : i32
    %4 = tpu.iota {dimensions = array<i32: 1>} : vector<1x256xi32>
    %5 = vector.broadcast %3 : i32 to vector<1x256xi32>
    %6 = arith.addi %4, %5 : vector<1x256xi32>
    %c256_i32_1 = arith.constant 256 : i32
    %7 = vector.broadcast %c256_i32_1 : i32 to vector<1x256xi32>
    %8 = arith.cmpi slt, %6, %7 : vector<1x256xi32>
    %c0 = arith.constant 0 : index
    %c0_2 = arith.constant 0 : index
    %c0_3 = arith.constant 0 : index
    %9 = vector.load %arg2[%c0, %c0_2, %c0_3] : memref<1x4x256xf32, #tpu.memory_space<vmem>>, vector<1x4x256xf32>
    %10 = vector.shape_cast %9 : vector<1x4x256xf32> to vector<4x256xf32>
    %cst = arith.constant 0.000000e+00 : f32
    %11 = vector.shape_cast %8 : vector<1x256xi1> to vector<1x256xi1>
    %12 = vector.broadcast %11 : vector<1x256xi1> to vector<4x256xi1>
    %13 = vector.broadcast %cst : f32 to vector<4x256xf32>
    %14 = arith.select %12, %10, %13 : vector<4x256xi1>, vector<4x256xf32>
    %c0_4 = arith.constant 0 : index
    %c0_5 = arith.constant 0 : index
    %15 = vector.load %arg3[%c0_4, %c0_5] : memref<4x1xf32, #tpu.memory_space<vmem>>, vector<4x1xf32>
    %16 = vector.broadcast %15 : vector<4x1xf32> to vector<4x256xf32>
    %17 = arith.mulf %14, %16 : vector<4x256xf32>
    %c0_6 = arith.constant 0 : index
    %c0_7 = arith.constant 0 : index
    %18 = vector.load %arg4[%c0_6, %c0_7] : memref<4x1xf32, #tpu.memory_space<vmem>>, vector<4x1xf32>
    %19 = vector.broadcast %18 : vector<4x1xf32> to vector<4x256xf32>
    %20 = arith.addf %17, %19 : vector<4x256xf32>
    %cst_8 = arith.constant 0.000000e+00 : f32
    %21 = vector.broadcast %cst_8 : f32 to vector<4x256xf32>
    %22 = arith.maximumf %20, %21 : vector<4x256xf32>
    %c0_9 = arith.constant 0 : index
    %c0_10 = arith.constant 0 : index
    %23 = vector.load %arg5[%c0_9, %c0_10] : memref<32x4xbf16, #tpu.memory_space<vmem>>, vector<32x4xbf16>
    %24 = arith.truncf %22 : vector<4x256xf32> to vector<4x256xbf16>
    %cst_11 = arith.constant dense<0.000000e+00> : vector<32x256xf32>
    %25 = tpu.matmul %23, %24, %cst_11 {dimension_numbers = #tpu.dot_dimension_numbers<[1], [0], [0], [1], [0, 0, 1, 1], [], []>} : vector<32x4xbf16>, vector<4x256xbf16>, vector<32x256xf32> -> vector<32x256xf32>
    %cst_12 = arith.constant 0.000000e+00 : f32
    %26 = vector.shape_cast %8 : vector<1x256xi1> to vector<1x256xi1>
    %27 = vector.broadcast %26 : vector<1x256xi1> to vector<32x256xi1>
    %28 = vector.broadcast %cst_12 : f32 to vector<32x256xf32>
    %29 = arith.select %27, %25, %28 : vector<32x256xi1>, vector<32x256xf32>
    %30 = arith.truncf %29 : vector<32x256xf32> to vector<32x256xbf16>
    %c0_13 = arith.constant 0 : index
    %c0_14 = arith.constant 0 : index
    %c0_15 = arith.constant 0 : index
    %31 = vector.load %arg6[%c0_13, %c0_14, %c0_15] : memref<1x32x256xbf16, #tpu.memory_space<vmem>>, vector<1x32x256xbf16>
    %32 = vector.shape_cast %31 : vector<1x32x256xbf16> to vector<32x256xbf16>
    %33 = vector.shape_cast %30 : vector<32x256xbf16> to vector<1x32x256xbf16>
    tpu.vector_store %arg6[%c0_13, %c0_14, %c0_15], %33 {strides = array<i32>} : memref<1x32x256xbf16, #tpu.memory_space<vmem>>, vector<1x32x256xbf16>,
    %c0_16 = arith.constant 0 : index
    %c0_17 = arith.constant 0 : index
    %c0_18 = arith.constant 0 : index
    %34 = vector.load %arg7[%c0_16, %c0_17, %c0_18] : memref<1x32x1xf32, #tpu.memory_space<vmem>>, vector<1x32x1xf32>
    %35 = vector.shape_cast %34 : vector<1x32x1xf32> to vector<32x1xf32>
    %cst_19 = arith.constant dense<0.000000e+00> : vector<32xf32>
    %36 = vector.multi_reduction <add>, %29, %cst_19 [1] : vector<32x256xf32> to vector<32xf32>
    %37 = vector.shape_cast %36 : vector<32xf32> to vector<32x1xf32>
    %38 = arith.addf %35, %37 : vector<32x1xf32>
    %c0_20 = arith.constant 0 : index
    %c0_21 = arith.constant 0 : index
    %c0_22 = arith.constant 0 : index
    %39 = vector.load %arg7[%c0_20, %c0_21, %c0_22] : memref<1x32x1xf32, #tpu.memory_space<vmem>>, vector<1x32x1xf32>
    %40 = vector.shape_cast %39 : vector<1x32x1xf32> to vector<32x1xf32>
    %41 = vector.shape_cast %38 : vector<32x1xf32> to vector<1x32x1xf32>
    tpu.vector_store %arg7[%c0_20, %c0_21, %c0_22], %41 {strides = array<i32>} : memref<1x32x1xf32, #tpu.memory_space<vmem>>, vector<1x32x1xf32>,
    %c0_23 = arith.constant 0 : index
    %c0_24 = arith.constant 0 : index
    %c0_25 = arith.constant 0 : index
    %42 = vector.load %arg8[%c0_23, %c0_24, %c0_25] : memref<1x32x1xf32, #tpu.memory_space<vmem>>, vector<1x32x1xf32>
    %43 = vector.shape_cast %42 : vector<1x32x1xf32> to vector<32x1xf32>
    %44 = arith.mulf %29, %29 : vector<32x256xf32>
    %cst_26 = arith.constant dense<0.000000e+00> : vector<32xf32>
    %45 = vector.multi_reduction <add>, %44, %cst_26 [1] : vector<32x256xf32> to vector<32xf32>
    %46 = vector.shape_cast %45 : vector<32xf32> to vector<32x1xf32>
    %47 = arith.addf %43, %46 : vector<32x1xf32>
    %c0_27 = arith.constant 0 : index
    %c0_28 = arith.constant 0 : index
    %c0_29 = arith.constant 0 : index
    %48 = vector.load %arg8[%c0_27, %c0_28, %c0_29] : memref<1x32x1xf32, #tpu.memory_space<vmem>>, vector<1x32x1xf32>
    %49 = vector.shape_cast %48 : vector<1x32x1xf32> to vector<32x1xf32>
    %50 = vector.shape_cast %47 : vector<32x1xf32> to vector<1x32x1xf32>
    tpu.vector_store %arg8[%c0_27, %c0_28, %c0_29], %50 {strides = array<i32>} : memref<1x32x1xf32, #tpu.memory_space<vmem>>, vector<1x32x1xf32>,
    return
  }
  func.func @transform_0(%arg0: i32, %arg1: i32) -> (i32, i32, i32) {
    %c0_i32 = arith.constant 0 : i32
    %c0_i32_0 = arith.constant 0 : i32
    return %arg0, %c0_i32, %arg1 : i32, i32, i32
  }
  func.func @transform_1(%arg0: i32, %arg1: i32) -> (i32, i32) {
    %c0_i32 = arith.constant 0 : i32
    %c0_i32_0 = arith.constant 0 : i32
    %c0_i32_1 = arith.constant 0 : i32
    return %c0_i32, %c0_i32_0 : i32, i32
  }
  func.func @transform_2(%arg0: i32, %arg1: i32) -> (i32, i32) {
    %c0_i32 = arith.constant 0 : i32
    %c0_i32_0 = arith.constant 0 : i32
    %c0_i32_1 = arith.constant 0 : i32
    return %c0_i32, %c0_i32_0 : i32, i32
  }
  func.func @transform_3(%arg0: i32, %arg1: i32) -> (i32, i32) {
    %c0_i32 = arith.constant 0 : i32
    %c0_i32_0 = arith.constant 0 : i32
    %c0_i32_1 = arith.constant 0 : i32
    return %c0_i32, %c0_i32_0 : i32, i32
  }
  func.func @transform_4(%arg0: i32, %arg1: i32) -> (i32, i32, i32) {
    %c0_i32 = arith.constant 0 : i32
    %c0_i32_0 = arith.constant 0 : i32
    return %arg0, %c0_i32, %arg1 : i32, i32, i32
  }
  func.func @transform_5(%arg0: i32, %arg1: i32) -> (i32, i32, i32) {
    %c0_i32 = arith.constant 0 : i32
    %c0_i32_0 = arith.constant 0 : i32
    %c0_i32_1 = arith.constant 0 : i32
    return %arg0, %c0_i32, %c0_i32_0 : i32, i32, i32
  }
  func.func @transform_6(%arg0: i32, %arg1: i32) -> (i32, i32, i32) {
    %c0_i32 = arith.constant 0 : i32
    %c0_i32_0 = arith.constant 0 : i32
    %c0_i32_1 = arith.constant 0 : i32
    return %arg0, %c0_i32, %c0_i32_0 : i32, i32, i32
  }
}

module attributes {stable_mosaic.version = 11 : i64} {
  func.func @_bn_relu_conv3_concat_kernel(%arg0: i32, %arg1: memref<1x32x256xbf16, #tpu.memory_space<vmem>>, %arg2: memref<1x4x256xf32, #tpu.memory_space<vmem>>, %arg3: memref<32x1xf32, #tpu.memory_space<vmem>>, %arg4: memref<32x1xf32, #tpu.memory_space<vmem>>, %arg5: memref<8x288xbf16, #tpu.memory_space<vmem>>, %arg6: memref<1x12x256xf32, #tpu.memory_space<vmem>>, %arg7: memref<32x290xbf16, #tpu.memory_space<vmem>>) attributes {dimension_semantics = [#tpu.dimension_semantics<parallel>], iteration_bounds = array<i64: 2>, scalar_prefetch = 0 : i64, scratch_operands = 1 : i64, tpu.core_type = #tpu.core_type<tc>, window_params = [{transform_indices = @transform_0, window_bounds = array<i64: 1, 32, 256>}, {transform_indices = @transform_1, window_bounds = array<i64: 1, 4, 256>}, {pipeline_mode = #tpu.pipeline_mode<synchronous>, transform_indices = @transform_2, window_bounds = array<i64: 32, 1>}, {pipeline_mode = #tpu.pipeline_mode<synchronous>, transform_indices = @transform_3, window_bounds = array<i64: 32, 1>}, {pipeline_mode = #tpu.pipeline_mode<synchronous>, transform_indices = @transform_4, window_bounds = array<i64: 8, 288>}, {transform_indices = @transform_5, window_bounds = array<i64: 1, 12, 256>}]} {
    %c0_i32 = arith.constant 0 : i32
    %0 = arith.cmpi eq, %arg0, %c0_i32 : i32
    %1 = arith.extui %0 : i1 to i32
    %c0_i32_0 = arith.constant 0 : i32
    %2 = arith.cmpi ne, %1, %c0_i32_0 : i32
    scf.if %2 {
      %cst_41 = arith.constant 0.000000e+00 : bf16
      %81 = vector.broadcast %cst_41 : bf16 to vector<32x17xbf16>
      %c0_42 = arith.constant 0 : index
      %c0_43 = arith.constant 0 : index
      %82 = vector.load %arg7[%c0_42, %c0_43] : memref<32x290xbf16, #tpu.memory_space<vmem>>, vector<32x17xbf16>
      tpu.vector_store %arg7[%c0_42, %c0_43], %81 {strides = array<i32>} : memref<32x290xbf16, #tpu.memory_space<vmem>>, vector<32x17xbf16>,
      %cst_44 = arith.constant 0.000000e+00 : bf16
      %83 = vector.broadcast %cst_44 : bf16 to vector<32x17xbf16>
      %c0_45 = arith.constant 0 : index
      %c273 = arith.constant 273 : index
      %84 = vector.load %arg7[%c0_45, %c273] : memref<32x290xbf16, #tpu.memory_space<vmem>>, vector<32x17xbf16>
      tpu.vector_store %arg7[%c0_45, %c273], %83 {strides = array<i32>} : memref<32x290xbf16, #tpu.memory_space<vmem>>, vector<32x17xbf16>,
    } else {
    }
    %c0 = arith.constant 0 : index
    %c0_1 = arith.constant 0 : index
    %c0_2 = arith.constant 0 : index
    %3 = vector.load %arg1[%c0, %c0_1, %c0_2] : memref<1x32x256xbf16, #tpu.memory_space<vmem>>, vector<1x32x256xbf16>
    %4 = vector.shape_cast %3 : vector<1x32x256xbf16> to vector<32x256xbf16>
    %5 = arith.extf %4 : vector<32x256xbf16> to vector<32x256xf32>
    %c0_3 = arith.constant 0 : index
    %c0_4 = arith.constant 0 : index
    %6 = vector.load %arg3[%c0_3, %c0_4] : memref<32x1xf32, #tpu.memory_space<vmem>>, vector<32x1xf32>
    %7 = vector.broadcast %6 : vector<32x1xf32> to vector<32x256xf32>
    %8 = arith.mulf %5, %7 : vector<32x256xf32>
    %c0_5 = arith.constant 0 : index
    %c0_6 = arith.constant 0 : index
    %9 = vector.load %arg4[%c0_5, %c0_6] : memref<32x1xf32, #tpu.memory_space<vmem>>, vector<32x1xf32>
    %10 = vector.broadcast %9 : vector<32x1xf32> to vector<32x256xf32>
    %11 = arith.addf %8, %10 : vector<32x256xf32>
    %cst = arith.constant 0.000000e+00 : f32
    %12 = vector.broadcast %cst : f32 to vector<32x256xf32>
    %13 = arith.maximumf %11, %12 : vector<32x256xf32>
    %14 = arith.truncf %13 : vector<32x256xf32> to vector<32x256xbf16>
    %c0_7 = arith.constant 0 : index
    %c17 = arith.constant 17 : index
    %15 = vector.load %arg7[%c0_7, %c17] : memref<32x290xbf16, #tpu.memory_space<vmem>>, vector<32x256xbf16>
    tpu.vector_store %arg7[%c0_7, %c17], %14 {strides = array<i32>} : memref<32x290xbf16, #tpu.memory_space<vmem>>, vector<32x256xbf16>,
    %16 = tpu.iota {dimensions = array<i32: 1>} : vector<1x256xi32>
    %c16_i32 = arith.constant 16 : i32
    %c0_i32_8 = arith.constant 0 : i32
    %17 = arith.cmpi eq, %c16_i32, %c0_i32_8 : i32
    %c1_i32 = arith.constant 1 : i32
    %18 = arith.select %17, %c1_i32, %c16_i32 : i32
    %19 = vector.broadcast %18 : i32 to vector<1x256xi32>
    %20 = arith.remsi %16, %19 : vector<1x256xi32>
    %c0_i32_9 = arith.constant 0 : i32
    %21 = vector.broadcast %c0_i32_9 : i32 to vector<1x256xi32>
    %22 = arith.cmpi ne, %20, %21 : vector<1x256xi32>
    %c0_i32_10 = arith.constant 0 : i32
    %23 = vector.broadcast %c0_i32_10 : i32 to vector<1x256xi32>
    %24 = arith.cmpi slt, %20, %23 : vector<1x256xi32>
    %c0_i32_11 = arith.constant 0 : i32
    %25 = arith.cmpi slt, %18, %c0_i32_11 : i32
    %26 = vector.broadcast %25 : i1 to vector<1x256xi1>
    %27 = vector.broadcast %26 : vector<1x256xi1> to vector<1x256xi1>
    %28 = arith.xori %24, %27 : vector<1x256xi1>
    %29 = arith.andi %28, %22 : vector<1x256xi1>
    %30 = vector.broadcast %18 : i32 to vector<1x256xi32>
    %31 = arith.addi %20, %30 : vector<1x256xi32>
    %32 = arith.select %29, %31, %20 : vector<1x256xi1>, vector<1x256xi32>
    %c0_i32_12 = arith.constant 0 : i32
    %33 = vector.broadcast %c0_i32_12 : i32 to vector<1x256xi32>
    %34 = arith.cmpi ne, %32, %33 : vector<1x256xi32>
    %c15_i32 = arith.constant 15 : i32
    %35 = vector.broadcast %c15_i32 : i32 to vector<1x256xi32>
    %36 = arith.cmpi ne, %32, %35 : vector<1x256xi32>
    %c0_13 = arith.constant 0 : index
    %c0_14 = arith.constant 0 : index
    %37 = vector.load %arg7[%c0_13, %c0_14] : memref<32x290xbf16, #tpu.memory_space<vmem>>, vector<32x256xbf16>
    %cst_15 = arith.constant 0.000000e+00 : bf16
    %38 = vector.broadcast %cst_15 : bf16 to vector<32x256xbf16>
    %39 = vector.shape_cast %34 : vector<1x256xi1> to vector<1x256xi1>
    %40 = vector.broadcast %39 : vector<1x256xi1> to vector<32x256xi1>
    %41 = arith.select %40, %37, %38 : vector<32x256xi1>, vector<32x256xbf16>
    %c0_16 = arith.constant 0 : index
    %c1 = arith.constant 1 : index
    %42 = vector.load %arg7[%c0_16, %c1] : memref<32x290xbf16, #tpu.memory_space<vmem>>, vector<32x256xbf16>
    %c0_17 = arith.constant 0 : index
    %c2 = arith.constant 2 : index
    %43 = vector.load %arg7[%c0_17, %c2] : memref<32x290xbf16, #tpu.memory_space<vmem>>, vector<32x256xbf16>
    %cst_18 = arith.constant 0.000000e+00 : bf16
    %44 = vector.broadcast %cst_18 : bf16 to vector<32x256xbf16>
    %45 = vector.shape_cast %36 : vector<1x256xi1> to vector<1x256xi1>
    %46 = vector.broadcast %45 : vector<1x256xi1> to vector<32x256xi1>
    %47 = arith.select %46, %43, %44 : vector<32x256xi1>, vector<32x256xbf16>
    %c0_19 = arith.constant 0 : index
    %c16 = arith.constant 16 : index
    %48 = vector.load %arg7[%c0_19, %c16] : memref<32x290xbf16, #tpu.memory_space<vmem>>, vector<32x256xbf16>
    %cst_20 = arith.constant 0.000000e+00 : bf16
    %49 = vector.broadcast %cst_20 : bf16 to vector<32x256xbf16>
    %50 = vector.shape_cast %34 : vector<1x256xi1> to vector<1x256xi1>
    %51 = vector.broadcast %50 : vector<1x256xi1> to vector<32x256xi1>
    %52 = arith.select %51, %48, %49 : vector<32x256xi1>, vector<32x256xbf16>
    %c0_21 = arith.constant 0 : index
    %c17_22 = arith.constant 17 : index
    %53 = vector.load %arg7[%c0_21, %c17_22] : memref<32x290xbf16, #tpu.memory_space<vmem>>, vector<32x256xbf16>
    %c0_23 = arith.constant 0 : index
    %c18 = arith.constant 18 : index
    %54 = vector.load %arg7[%c0_23, %c18] : memref<32x290xbf16, #tpu.memory_space<vmem>>, vector<32x256xbf16>
    %cst_24 = arith.constant 0.000000e+00 : bf16
    %55 = vector.broadcast %cst_24 : bf16 to vector<32x256xbf16>
    %56 = vector.shape_cast %36 : vector<1x256xi1> to vector<1x256xi1>
    %57 = vector.broadcast %56 : vector<1x256xi1> to vector<32x256xi1>
    %58 = arith.select %57, %54, %55 : vector<32x256xi1>, vector<32x256xbf16>
    %c0_25 = arith.constant 0 : index
    %c32 = arith.constant 32 : index
    %59 = vector.load %arg7[%c0_25, %c32] : memref<32x290xbf16, #tpu.memory_space<vmem>>, vector<32x256xbf16>
    %cst_26 = arith.constant 0.000000e+00 : bf16
    %60 = vector.broadcast %cst_26 : bf16 to vector<32x256xbf16>
    %61 = vector.shape_cast %34 : vector<1x256xi1> to vector<1x256xi1>
    %62 = vector.broadcast %61 : vector<1x256xi1> to vector<32x256xi1>
    %63 = arith.select %62, %59, %60 : vector<32x256xi1>, vector<32x256xbf16>
    %c0_27 = arith.constant 0 : index
    %c33 = arith.constant 33 : index
    %64 = vector.load %arg7[%c0_27, %c33] : memref<32x290xbf16, #tpu.memory_space<vmem>>, vector<32x256xbf16>
    %c0_28 = arith.constant 0 : index
    %c34 = arith.constant 34 : index
    %65 = vector.load %arg7[%c0_28, %c34] : memref<32x290xbf16, #tpu.memory_space<vmem>>, vector<32x256xbf16>
    %cst_29 = arith.constant 0.000000e+00 : bf16
    %66 = vector.broadcast %cst_29 : bf16 to vector<32x256xbf16>
    %67 = vector.shape_cast %36 : vector<1x256xi1> to vector<1x256xi1>
    %68 = vector.broadcast %67 : vector<1x256xi1> to vector<32x256xi1>
    %69 = arith.select %68, %65, %66 : vector<32x256xi1>, vector<32x256xbf16>
    %70 = tpu.concatenate %41, %42, %47, %52, %53, %58, %63, %64, %69 in 0 : vector<32x256xbf16>, vector<32x256xbf16>, vector<32x256xbf16>, vector<32x256xbf16>, vector<32x256xbf16>, vector<32x256xbf16>, vector<32x256xbf16>, vector<32x256xbf16>, vector<32x256xbf16> -> vector<288x256xbf16>
    %c0_30 = arith.constant 0 : index
    %c0_31 = arith.constant 0 : index
    %71 = vector.load %arg5[%c0_30, %c0_31] : memref<8x288xbf16, #tpu.memory_space<vmem>>, vector<8x288xbf16>
    %cst_32 = arith.constant dense<0.000000e+00> : vector<8x256xf32>
    %72 = tpu.matmul %71, %70, %cst_32 {dimension_numbers = #tpu.dot_dimension_numbers<[1], [0], [0], [1], [0, 0, 1, 1], [], []>} : vector<8x288xbf16>, vector<288x256xbf16>, vector<8x256xf32> -> vector<8x256xf32>
    %c0_33 = arith.constant 0 : index
    %c0_34 = arith.constant 0 : index
    %c0_35 = arith.constant 0 : index
    %73 = vector.load %arg6[%c0_33, %c0_34, %c0_35] : memref<1x12x256xf32, #tpu.memory_space<vmem>>, vector<1x8x256xf32>
    %74 = vector.shape_cast %73 : vector<1x8x256xf32> to vector<8x256xf32>
    %75 = vector.shape_cast %72 : vector<8x256xf32> to vector<1x8x256xf32>
    tpu.vector_store %arg6[%c0_33, %c0_34, %c0_35], %75 {strides = array<i32>} : memref<1x12x256xf32, #tpu.memory_space<vmem>>, vector<1x8x256xf32>,
    %c0_36 = arith.constant 0 : index
    %c0_37 = arith.constant 0 : index
    %c0_38 = arith.constant 0 : index
    %76 = vector.load %arg2[%c0_36, %c0_37, %c0_38] : memref<1x4x256xf32, #tpu.memory_space<vmem>>, vector<1x4x256xf32>
    %77 = vector.shape_cast %76 : vector<1x4x256xf32> to vector<4x256xf32>
    %c0_39 = arith.constant 0 : index
    %c8 = arith.constant 8 : index
    %c0_40 = arith.constant 0 : index
    %78 = vector.load %arg6[%c0_39, %c8, %c0_40] : memref<1x12x256xf32, #tpu.memory_space<vmem>>, vector<1x4x256xf32>
    %79 = vector.shape_cast %78 : vector<1x4x256xf32> to vector<4x256xf32>
    %80 = vector.shape_cast %77 : vector<4x256xf32> to vector<1x4x256xf32>
    tpu.vector_store %arg6[%c0_39, %c8, %c0_40], %80 {strides = array<i32>} : memref<1x12x256xf32, #tpu.memory_space<vmem>>, vector<1x4x256xf32>,
    return
  }
  func.func @transform_0(%arg0: i32) -> (i32, i32, i32) {
    %c0_i32 = arith.constant 0 : i32
    %c0_i32_0 = arith.constant 0 : i32
    %c0_i32_1 = arith.constant 0 : i32
    return %arg0, %c0_i32, %c0_i32_0 : i32, i32, i32
  }
  func.func @transform_1(%arg0: i32) -> (i32, i32, i32) {
    %c0_i32 = arith.constant 0 : i32
    %c0_i32_0 = arith.constant 0 : i32
    %c0_i32_1 = arith.constant 0 : i32
    return %arg0, %c0_i32, %c0_i32_0 : i32, i32, i32
  }
  func.func @transform_2(%arg0: i32) -> (i32, i32) {
    %c0_i32 = arith.constant 0 : i32
    %c0_i32_0 = arith.constant 0 : i32
    %c0_i32_1 = arith.constant 0 : i32
    return %c0_i32, %c0_i32_0 : i32, i32
  }
  func.func @transform_3(%arg0: i32) -> (i32, i32) {
    %c0_i32 = arith.constant 0 : i32
    %c0_i32_0 = arith.constant 0 : i32
    %c0_i32_1 = arith.constant 0 : i32
    return %c0_i32, %c0_i32_0 : i32, i32
  }
  func.func @transform_4(%arg0: i32) -> (i32, i32) {
    %c0_i32 = arith.constant 0 : i32
    %c0_i32_0 = arith.constant 0 : i32
    %c0_i32_1 = arith.constant 0 : i32
    return %c0_i32, %c0_i32_0 : i32, i32
  }
  func.func @transform_5(%arg0: i32) -> (i32, i32, i32) {
    %c0_i32 = arith.constant 0 : i32
    %c0_i32_0 = arith.constant 0 : i32
    %c0_i32_1 = arith.constant 0 : i32
    return %arg0, %c0_i32, %c0_i32_0 : i32, i32, i32
  }
}

</mosaic_0001>

<bundles_post_ra>
// kernel: bottleneck_forward.2
= control target key start
LH: loop header
LB: loop body
LE: loop exit
PB: predicated region body
PF: predicated region fallthrough
CT: control target
= control target key end

     0   :  { %s821_s21 = smov 0   ;;  %s823_s22 = smov 0   ;;  %s916_s0 = inlined_call_operand.vmem [shape: f32[2,4,256], index: 0, kind: input, shape index: {}]   ;;  %s917_s1 = inlined_call_operand.vmem [shape: f32[4,1], index: 1, kind: input, shape index: {}]   ;;  %s918_s2 = inlined_call_operand.vmem [shape: f32[4,1], index: 2, kind: input, shape index: {}]   ;;  %s919_s3 = inlined_call_operand.vmem [shape: bf16[32,4], index: 3, kind: input, shape index: {}]   ;;  %s920_s4 = inlined_call_operand.vmem [shape: bf16[2,32,256], index: 4, kind: output, shape index: {0}]   ;;  %s921_s5 = inlined_call_operand.vmem [shape: f32[2,32,1], index: 5, kind: output, shape index: {1}]   ;;  %s922_s6 = inlined_call_operand.vmem [shape: f32[2,32,1], index: 6, kind: output, shape index: {2}]  }
   0x1   :  { %s825_s23 = smov 0  }
   0x2 LB: > { %s29_s24 = sadd.s32 1, %s778_s22  ;;  %p700_p0 = scmp.ge.s32.totalorder %s782_s23, 1  ;;  %s782_s23 = sphi %s825_s23, %s17_s23   ;;  %s778_s22 = sphi %s823_s22, %s924_s22   ;;  %s774_s21 = sphi %s821_s21, %s923_s21  }
   0x3   : > { %p31_p1 = scmp.ge.s32.totalorder %s29_s24, 2  ;;  %p238_p2 = scmp.lt.s32.totalorder %s782_s23, 3 }
   0x5   : > { %s926_s24 = smov (%p31_p1, %s29_s24), 0  ;;  %p239_p3 = pnand %p700_p0, %p238_p2 }
   0x6   : > { %v349_v0 = vld [vmem:[%s917_s1] sm:$0xf] (!%p239_p3)  ;;  %v784_v1 = vmov (!%p239_p3), 0   ;;  %p287_p4 = scmp.lt.s32.totalorder (!%p239_p3), %s774_s21, 1  ;;  %vm390_vm0 = vcmask (!%p239_p3), 1041408   ;;  %v759_v17 = vld [vmem:[%s919_s3 + $0x8] sm:$0xff] (!%p239_p3)  }
   0x7   : > { %242 = sbr.rel (%p239_p3) target bundleno = 534 (0x216), region = 36  ;;  %756 = vset.pattern.permute.xlu0 (!%p239_p3), %v784_v1  ;;  %429 = vmatprep.mubr.bf16.mxu0 (!%p239_p3), %v784_v1  ;;  %v357_v2 = vld [vmem:[%s918_s2] sm:$0xf] (!%p239_p3)  ;;  %vm383_vm1 = vcmask (!%p239_p3), 31744   ;;  %vm321_vm2 = vcmask (!%p239_p3), 7168   ;;  %v785_v18 = vmov (!%p239_p3), 0.0  }
   0x8   : > { %352 = vperm.xlu0 (!%p239_p3), %756, %v349_v0   ;;  %439 = vmatprep.mubr.bf16.mxu1 (!%p239_p3), %v784_v1  ;;  %v758_v16 = vld [vmem:[%s919_s3] sm:$0xff] (!%p239_p3)  }
   0xc   : > { %360 = vperm.xlu0 (!%p239_p3), %756, %v357_v2  }
   0xe   : > { %s928_s21 = smov (!%p287_p4, %s774_s21), 1 }
   0xf   : > { %s720_s29 = sshll.u32 %s928_s21, 3  ;;  %s721_s13 = sshll.u32 %s928_s21, 5 }
  0x10   : > { %s294_s8 = scalar_lea.vmem %s916_s0, %s720_s29  ;;  %s857_s16 = scalar_lea.vmem %s921_s5, %s721_s13 }
  0x11   : > { %v339_v3 = vld [vmem:[%s294_s8] sm:$0xff]  ;;  %s862_s19 = scalar_lea.vmem %s922_s6, %s721_s13  ;;  %322 = vst.msk [vmem:[%s857_s16] sm:$0xff] %vm321_vm2, %v785_v18  ;;  %323 = vst.msk [vmem:[%s857_s16 + $0x8] sm:$0xff] %vm321_vm2, %v785_v18  ;;  %s304_s25 = scalar_lea.vmem %s920_s4, %s721_s13 }
  0x12   : > { %v345_v4 = vcombine.high %v339_v3, %v339_v3  ;;  %324 = vst.msk [vmem:[%s857_s16 + $0x10] sm:$0xff] %vm321_vm2, %v785_v18  ;;  %325 = vst.msk [vmem:[%s857_s16 + $0x18] sm:$0xff] %vm321_vm2, %v785_v18 }
  0x13   : > { %326 = vst.msk [vmem:[%s862_s19] sm:$0xff] %vm321_vm2, %v785_v18  ;;  %327 = vst.msk [vmem:[%s862_s19 + $0x8] sm:$0xff] %vm321_vm2, %v785_v18 }
  0x14   : > { %328 = vst.msk [vmem:[%s862_s19 + $0x10] sm:$0xff] %vm321_vm2, %v785_v18  ;;  %329 = vst.msk [vmem:[%s862_s19 + $0x18] sm:$0xff] %vm321_vm2, %v785_v18 }
  0x18   : > { %v486_v47 = vld [vmem:[%s857_s16] sm:$0xff]  ;;  %v487_v52 = vld [vmem:[%s857_s16 + $0x8] sm:$0xff] }
  0x19   : > { %v488_v48 = vld [vmem:[%s857_s16 + $0x10] sm:$0xff]  ;;  %v489_v56 = vld [vmem:[%s857_s16 + $0x18] sm:$0xff] }
  0x1a   : > { %v511_v59 = vld [vmem:[%s862_s19] sm:$0xff]  ;;  %v512_v1 = vld [vmem:[%s862_s19 + $0x8] sm:$0xff] }
  0x1b   : > { %v513_v62 = vld [vmem:[%s862_s19 + $0x10] sm:$0xff] }
  0x87   : > { %v353_v5 = vpop.permute.xlu0 %352 }
  0x88   : > { %v355_v6 = vmul.f32 %v353_v5, %v339_v3  ;;  %v356_v7 = vmul.f32 %v353_v5, %v345_v4  ;;  %v514_v4 = vld [vmem:[%s862_s19 + $0x18] sm:$0xff] }
  0x8b   : > { %v361_v8 = vpop.permute.xlu0 %360 }
  0x8c   : > { %v363_v9 = vadd.f32 %v361_v8, %v355_v6  ;;  %v364_v10 = vadd.f32 %v361_v8, %v356_v7 }
  0x8e   : > { %v365_v11 = vmax.f32 %v363_v9, 0.0  ;;  %v366_v12 = vmax.f32 %v364_v10, 0.0 }
  0x90   : > { %v372_v13 = vpack.c.bf16 %v366_v12, %v366_v12  ;;  %v371_v14 = vpack.c.bf16 %v365_v11, %v365_v11 }
  0x92   : > { %711 = vmatprep.subr.msk.bf16.mxu0 %vm390_vm0, %v372_v13  ;;  %728 = vmatprep.subr.msk.bf16.mxu1 %vm390_vm0, %v372_v13  ;;  %v392_v15 = vsel %vm390_vm0, %v371_v14, 0 }
  0x93   : > { %398 = vmatpush1.bf16.msra.mxu0 %v392_v15  ;;  %729 = vmatpush1.bf16.msra.mxu1 %v392_v15 }
  0x96   : > { %712 = vmatmul.mubr.msk.bf16.vlgmr.msra.gmra.mrb[0].mxu0 %vm383_vm1, %v758_v16  ;;  %713 = vmatmul.mubr.msk.bf16.vlgmr.msra.gmra.mrb[0].mxu1 %vm383_vm1, %v759_v17 }
 0x169   : > { %v431_v19 = vpop.f32.mrb[0].mxu0  ;;  %v441_v20 = vpop.f32.mrb[0].mxu1 }
 0x16a   : > { %v433_v21 = vpop.f32.mrb[1].mxu0  ;;  %v443_v22 = vpop.f32.mrb[1].mxu1  ;;  %v515_v23 = vmul.f32 %v431_v19, %v431_v19  ;;  %v519_v24 = vmul.f32 %v441_v20, %v441_v20 }
 0x16b   : > { %v724_v25 = vpack.c.bf16 %v433_v21, %v431_v19  ;;  %v435_v26 = vpop.f32.mrb[2].mxu0  ;;  %v726_v27 = vpack.c.bf16 %v443_v22, %v441_v20  ;;  %v490_v28 = vadd.f32 %v433_v21, %v431_v19  ;;  %v445_v29 = vpop.f32.mrb[2].mxu1  ;;  %v496_v30 = vadd.f32 %v443_v22, %v441_v20 }
 0x16c   : > { %v437_v31 = vpop.f32.mrb[3].mxu0  ;;  %v447_v32 = vpop.f32.mrb[3].mxu1  ;;  %v516_v33 = vmul.f32 %v433_v21, %v433_v21  ;;  %v520_v34 = vmul.f32 %v443_v22, %v443_v22  ;;  %v517_v35 = vmul.f32 %v435_v26, %v435_v26  ;;  %v521_v36 = vmul.f32 %v445_v29, %v445_v29 }
 0x16d   : > { %482 = vst [vmem:[%s304_s25] sm:$0xff] %v724_v25  ;;  %v725_v37 = vpack.c.bf16 %v437_v31, %v435_v26  ;;  %v518_v38 = vmul.f32 %v437_v31, %v437_v31  ;;  %484 = vst [vmem:[%s304_s25 + $0x10] sm:$0xff] %v726_v27  ;;  %491 = vadd.xlane.f32.xlu1 %v490_v28  ;;  %v727_v39 = vpack.c.bf16 %v447_v32, %v445_v29 }
 0x16e   : > { %v522_v40 = vmul.f32 %v447_v32, %v447_v32  ;;  %v493_v41 = vadd.f32 %v437_v31, %v435_v26  ;;  %497 = vadd.xlane.f32.xlu0 %v496_v30  ;;  %v499_v42 = vadd.f32 %v447_v32, %v445_v29  ;;  %v523_v43 = vadd.f32 %v516_v33, %v515_v23 }
 0x16f   : > { %v529_v44 = vadd.f32 %v520_v34, %v519_v24  ;;  %483 = vst [vmem:[%s304_s25 + $0x8] sm:$0xff] %v725_v37  ;;  %485 = vst [vmem:[%s304_s25 + $0x18] sm:$0xff] %v727_v39  ;;  %v526_v45 = vadd.f32 %v518_v38, %v517_v35 }
 0x170   : > { %v532_v46 = vadd.f32 %v522_v40, %v521_v36 }
 0x171   : > { %494 = vadd.xlane.f32.xlu1 %v493_v41 }
 0x175   : > { %500 = vadd.xlane.f32.xlu1 %v499_v42 }
 0x179   : > { %524 = vadd.xlane.f32.xlu1 %v523_v43 }
 0x17d   : > { %530 = vadd.xlane.f32.xlu1 %v529_v44 }
 0x181   : > { %527 = vadd.xlane.f32.xlu1 %v526_v45 }
 0x185   : > { %533 = vadd.xlane.f32.xlu1 %v532_v46 }
 0x1fa   : > { %v492_v49 = vpop.xlane.xlu1 %491 }
 0x1fb   : > { %v502_v50 = vadd.f32 %v492_v49, %v486_v47  ;;  %v498_v51 = vpop.xlane.xlu0 %497 }
 0x1fc   : > { %v504_v53 = vadd.f32 %v498_v51, %v488_v48 }
 0x1fd   : > { %507 = vst.msk [vmem:[%s857_s16] sm:$0xff] %vm321_vm2, %v502_v50 }
 0x1fe   : > { %v495_v54 = vpop.xlane.xlu1 %494  ;;  %509 = vst.msk [vmem:[%s857_s16 + $0x10] sm:$0xff] %vm321_vm2, %v504_v53 }
 0x1ff   : > { %v503_v55 = vadd.f32 %v495_v54, %v487_v52 }
 0x201   : > { %508 = vst.msk [vmem:[%s857_s16 + $0x8] sm:$0xff] %vm321_vm2, %v503_v55 }
 0x202   : > { %v501_v57 = vpop.xlane.xlu1 %500 }
 0x203   : > { %v505_v58 = vadd.f32 %v501_v57, %v489_v56 }
 0x205   : > { %510 = vst.msk [vmem:[%s857_s16 + $0x18] sm:$0xff] %vm321_vm2, %v505_v58 }
 0x206   : > { %v525_v60 = vpop.xlane.xlu1 %524 }
 0x207   : > { %v535_v61 = vadd.f32 %v525_v60, %v511_v59 }
 0x209   : > { %539 = vst.msk [vmem:[%s862_s19] sm:$0xff] %vm321_vm2, %v535_v61 }
 0x20a   : > { %v531_v63 = vpop.xlane.xlu1 %530 }
 0x20b   : > { %v537_v0 = vadd.f32 %v531_v63, %v513_v62 }
 0x20d   : > { %541 = vst.msk [vmem:[%s862_s19 + $0x10] sm:$0xff] %vm321_vm2, %v537_v0 }
 0x20e   : > { %v528_v2 = vpop.xlane.xlu1 %527 }
 0x20f   : > { %v536_v3 = vadd.f32 %v528_v2, %v512_v1 }
 0x211   : > { %540 = vst.msk [vmem:[%s862_s19 + $0x8] sm:$0xff] %vm321_vm2, %v536_v3 }
 0x212   : > { %v534_v5 = vpop.xlane.xlu1 %533 }
 0x213   : > { %v538_v6 = vadd.f32 %v534_v5, %v514_v4 }
 0x215   : > { %542 = vst.msk [vmem:[%s862_s19 + $0x18] sm:$0xff] %vm321_vm2, %v538_v6 }
 0x216 PF: > { %s17_s23 = sadd.s32 1, %s782_s23   ;;  %s923_s21 = smov %s778_s22 }
 0x217   : > { %p14_p5 = scmp.ge.s32.totalorder %s17_s23, 4   ;;  %s924_s22 = smov %s926_s24 }
 0x219   :  { %16 = sbr.rel (!%p14_p5) target bundleno = 2 (0x2), region = 94 }

// kernel: bottleneck_forward.3
= control target key start
LH: loop header
LB: loop body
LE: loop exit
PB: predicated region body
PF: predicated region fallthrough
CT: control target
= control target key end

     0   :  { %s1007_s18 = smov 0   ;;  %s1224_s0 = inlined_call_operand.vmem [shape: bf16[2,32,256], index: 0, kind: input, shape index: {}]   ;;  %s1225_s1 = inlined_call_operand.vmem [shape: f32[2,4,256], index: 1, kind: input, shape index: {}]   ;;  %s1226_s2 = inlined_call_operand.vmem [shape: f32[32,1], index: 2, kind: input, shape index: {}]   ;;  %s1227_s3 = inlined_call_operand.vmem [shape: f32[32,1], index: 3, kind: input, shape index: {}]   ;;  %s1228_s4 = inlined_call_operand.vmem [shape: bf16[8,288], index: 4, kind: input, shape index: {}]   ;;  %s1229_s5 = inlined_call_operand.vmem [shape: f32[2,12,256], index: 5, kind: output, shape index: {}]  }
   0x1 LB: > { %s898_s19 = sadd.s32 4294967295, %s959_s18   ;;  %p902_p0 = scmp.ge.s32.totalorder %s959_s18, 1  ;;  %s959_s18 = sphi %s1007_s18, %s15_s18  }
   0x2   : > { %p197_p1 = scmp.lt.s32.totalorder %s959_s18, 3 }
   0x4   : > { %p198_p2 = pnand %p902_p0, %p197_p1 }
   0x5   : > { %p230_p3 = scmp.lt.s32.totalorder (!%p198_p2), %s898_s19, 1  ;;  %p909_p4 = scmp.ne.s32.totalorder (!%p198_p2), %s898_s19, 0 }
   0x6   : > { %201 = sbr.rel (%p198_p2) target bundleno = 716 (0x2cc), region = 40 }
   0xd   : > { %s231_s20 = scalar_select %p230_p3, %s898_s19, 1 }
   0xe   : > { %251 = sbr.rel (%p909_p4) target bundleno = 21 (0x15), region = 44  ;;  %vm252_vm0 = vcmask (!%p909_p4), 138240   ;;  %vm255_vm1 = vcmask (!%p909_p4), 277640   ;;  %v961_v0 = vmov (!%p909_p4), 0  }
   0xf   : > { %s918_s21 = sshll.u32 %s231_s20, 5  ;;  %s919_s22 = sshll.u32 %s231_s20, 3  ;;  %253 = vst.msk [vmem:[#allocation2] sm:$0xff] (!%p909_p4), %vm252_vm0, %v961_v0  ;;  %254 = vst.msk [vmem:[#allocation2 + $0x18] sm:$0xff] (!%p909_p4), %vm252_vm0, %v961_v0 }
  0x10   : > { %s1018_s25 = scalar_lea.vmem %s1224_s0, %s918_s21  ;;  %s1023_s28 = scalar_lea.vmem %s1225_s1, %s919_s22  ;;  %256 = vst.msk [vmem:[#allocation2 + $0x10] sm:$0xff] (!%p909_p4), %vm255_vm1, %v961_v0  ;;  %257 = vst.msk [vmem:[#allocation2 + $0x28] sm:$0xff] (!%p909_p4), %vm255_vm1, %v961_v0 }
  0x11   : > { %s1028_s6 = scalar_lea.vmem %s1229_s5, %s918_s21 }
  0x15 PF: > { %v302_v1 = vld [vmem:[%s1227_s3] sm:$0xff]  ;;  %v962_v3 = vmov 0   ;;  %v303_v4 = vld [vmem:[%s1227_s3 + $0x8] sm:$0xff]  ;;  %v273_v6 = vld [vmem:[%s1226_s2 + $0x18] sm:$0xff]  ;;  %v375_v11 = vlaneseq  ;;  %s963_s24 = smov 17   ;;  %s965_s26 = smov 16  }
  0x16   : > { %v270_v2 = vld [vmem:[%s1226_s2] sm:$0xff]  ;;  %948 = vset.pattern.permute.xlu1 %v962_v3  ;;  %947 = vset.pattern.permute.xlu0 %v962_v3  ;;  %v271_v5 = vld [vmem:[%s1226_s2 + $0x8] sm:$0xff]  ;;  %v272_v7 = vld [vmem:[%s1226_s2 + $0x10] sm:$0xff]  ;;  %s966_s27 = smov 18   ;;  %s967_s29 = smov 32   ;;  %vm358_vm8 = vcmask 138240  }
  0x17   : > { %308 = vperm.xlu1 %948, %v302_v1   ;;  %276 = vperm.xlu0 %947, %v270_v2   ;;  %v305_v8 = vld [vmem:[%s1227_s3 + $0x18] sm:$0xff]  ;;  %v304_v9 = vld [vmem:[%s1227_s3 + $0x10] sm:$0xff]  ;;  %v258_v10 = vld [vmem:[%s1018_s25] sm:$0xff]  ;;  %v376_v15 = vand.u32 127, %v375_v11  ;;  %v417_v41 = vshrl.u32 %v375_v11, 7  ;;  %s968_s30 = smov 34  }
  0x18   : > { %814 = vmatprep.mubr.bf16.mxu0 %v962_v3  ;;  %v262_v12 = vunpack.c.l.bf16 %v258_v10  ;;  %v263_v13 = vunpack.c.h.bf16 %v258_v10  ;;  %v259_v14 = vld [vmem:[%s1018_s25 + $0x8] sm:$0xff]  ;;  %v261_v23 = vld [vmem:[%s1018_s25 + $0x18] sm:$0xff]  ;;  %v260_v26 = vld [vmem:[%s1018_s25 + $0x10] sm:$0xff]  ;;  %s964_s25 = smov 2   ;;  %vm367_vm9 = vcmask 1047688   ;;  %s969_s7 = smov 127  }
  0x19   : > { %v264_v20 = vunpack.c.l.bf16 %v259_v14  ;;  %v265_v21 = vunpack.c.h.bf16 %v259_v14  ;;  %v377_v22 = vadd.s32 128, %v376_v15  ;;  %v268_v31 = vunpack.c.l.bf16 %v261_v23  ;;  %s970_s8 = smov 111   ;;  %s971_s9 = smov 126  }
  0x1a   : > { %v269_v32 = vunpack.c.h.bf16 %v261_v23  ;;  %v382_v33 = vand.u32 15, %v376_v15  ;;  %v266_v37 = vunpack.c.l.bf16 %v260_v26  ;;  %v267_v38 = vunpack.c.h.bf16 %v260_v26  ;;  %s972_s10 = smov 112   ;;  %s973_s11 = smov 110  }
  0x1b   : > { %313 = vperm.xlu1 %948, %v303_v4   ;;  %281 = vperm.xlu0 %947, %v271_v5   ;;  %v389_v34 = vand.u32 15, %v377_v22  ;;  %v422_v60 = vsub.s32 4, %v417_v41  ;;  %v418_v61 = vsub.s32 0, %v417_v41  ;;  %vm450_vm0 = vcmask 15360   ;;  %s974_s12 = smov 96   ;;  %s975_s13 = smov 95  }
  0x1c   : > { %vm1061_vm2 = vcmp.ne.s32.totalorder %v382_v33, 15  ;;  %vm402_vm5 = vcmp.ne.s32.totalorder %v382_v33, 0  ;;  %s976_s14 = smov 94  }
  0x1d   : > { %vm1065_vm3 = vcmp.ne.s32.totalorder %v389_v34, 15  ;;  %vm403_vm6 = vcmp.ne.s32.totalorder %v389_v34, 0 }
  0x1e   : > { %vm436_vm4 = vmpackc.low %vm1065_vm3, %vm1061_vm2 }
  0x1f   : > { %291 = vperm.xlu1 %948, %v273_v6   ;;  %286 = vperm.xlu0 %947, %v272_v7   ;;  %v437_v2 = vsel %vm436_vm4, 65537, %v962_v3  ;;  %vm414_vm7 = vmpackc.low %vm403_vm6, %vm402_vm5  ;;  %vm465_vm4 = vcmask 130048  }
  0x20   : > { %v445_v6 = vrot.slane %v437_v2, %v422_v60  ;;  %v441_v7 = vrot.slane %v437_v2, %v418_v61 }
  0x23   : > { %323 = vperm.xlu1 %948, %v305_v8   ;;  %318 = vperm.xlu0 %947, %v304_v9   ;;  %v415_v8 = vsel %vm414_vm7, 65537, %v962_v3 }
  0x24   : > { %v423_v9 = vrot.slane %v415_v8, %v422_v60  ;;  %v419_v10 = vrot.slane %v415_v8, %v418_v61 }
  0x26   : > { %vm425_vm10 = vcmp.ne.s16.totalorder %v423_v9, 0  ;;  %vm424_vm11 = vcmp.ne.s16.totalorder %v419_v10, 0 }
  0x96   : > { %v309_v16 = vpop.permute.xlu1 %308  ;;  %v277_v17 = vpop.permute.xlu0 %276 }
  0x97   : > { %v294_v18 = vmul.f32 %v277_v17, %v262_v12  ;;  %v295_v19 = vmul.f32 %v277_v17, %v263_v13 }
  0x99   : > { %v326_v27 = vadd.f32 %v309_v16, %v294_v18  ;;  %v327_v28 = vadd.f32 %v309_v16, %v295_v19 }
  0x9a   : > { %v314_v24 = vpop.permute.xlu1 %313  ;;  %v282_v25 = vpop.permute.xlu0 %281 }
  0x9b   : > { %v296_v29 = vmul.f32 %v282_v25, %v264_v20  ;;  %v297_v30 = vmul.f32 %v282_v25, %v265_v21  ;;  %v334_v42 = vmax.f32 %v326_v27, 0.0  ;;  %v335_v43 = vmax.f32 %v327_v28, 0.0 }
  0x9d   : > { %v328_v35 = vadd.f32 %v314_v24, %v296_v29  ;;  %v329_v36 = vadd.f32 %v314_v24, %v297_v30 }
  0x9e   : > { %v292_v39 = vpop.permute.xlu1 %291  ;;  %v287_v40 = vpop.permute.xlu0 %286 }
  0x9f   : > { %v336_v44 = vmax.f32 %v328_v35, 0.0  ;;  %v337_v45 = vmax.f32 %v329_v36, 0.0  ;;  %v300_v46 = vmul.f32 %v292_v39, %v268_v31  ;;  %v301_v47 = vmul.f32 %v292_v39, %v269_v32 }
  0xa0   : > { %v298_v50 = vmul.f32 %v287_v40, %v266_v37  ;;  %v299_v51 = vmul.f32 %v287_v40, %v267_v38 }
  0xa1   : > { %v343_v52 = vpack.c.bf16 %v337_v45, %v335_v43  ;;  %v342_v53 = vpack.c.bf16 %v336_v44, %v334_v42 }
  0xa2   : > { %v324_v54 = vpop.permute.xlu1 %323  ;;  %v319_v55 = vpop.permute.xlu0 %318 }
  0xa3   : > { %v332_v56 = vadd.f32 %v324_v54, %v300_v46  ;;  %v333_v57 = vadd.f32 %v324_v54, %v301_v47  ;;  %v330_v58 = vadd.f32 %v319_v55, %v298_v50  ;;  %v331_v59 = vadd.f32 %v319_v55, %v299_v51  ;;  %352 = vrot.lane.b32.xlu1 %v343_v52, %s963_s24 }
  0xa4   : > { %350 = vrot.lane.b32.xlu0 %v342_v53, %s963_s24 }
  0xa5   : > { %v340_v62 = vmax.f32 %v332_v56, 0.0  ;;  %v341_v63 = vmax.f32 %v333_v57, 0.0  ;;  %v338_v0 = vmax.f32 %v330_v58, 0.0  ;;  %v339_v1 = vmax.f32 %v331_v59, 0.0 }
  0xa7   : > { %v345_v4 = vpack.c.bf16 %v341_v63, %v339_v1  ;;  %v344_v5 = vpack.c.bf16 %v340_v62, %v338_v0  ;;  %v1181_v63 = vld [vmem:[%s1228_s4] sm:$0xff] }
  0xa8   : > { %v911_v0 = vcombine.high %v1181_v63, %v1181_v63 }
  0xa9   : > { %356 = vrot.lane.b32.xlu1 %v345_v4, %s963_s24  ;;  %354 = vrot.lane.b32.xlu0 %v344_v5, %s963_s24 }
  0xaa   : > { %773 = vmatprep.mubr.bf16.mxu1 %v911_v0 }
  0xad   : > { %448 = vrot.lane.b32.xlu1 %v445_v6, %s964_s25  ;;  %446 = vrot.lane.b32.xlu0 %v441_v7, %s964_s25 }
  0xb1   : > { %463 = vrot.lane.b32.xlu1 %v423_v9, %s965_s26  ;;  %461 = vrot.lane.b32.xlu0 %v419_v10, %s965_s26 }
  0xb5   : > { %478 = vrot.lane.b32.xlu1 %v445_v6, %s966_s27  ;;  %476 = vrot.lane.b32.xlu0 %v441_v7, %s966_s27 }
  0xb9   : > { %493 = vrot.lane.b32.xlu1 %v423_v9, %s967_s29  ;;  %491 = vrot.lane.b32.xlu0 %v419_v10, %s967_s29 }
  0xbd   : > { %508 = vrot.lane.b32.xlu1 %v445_v6, %s968_s30  ;;  %506 = vrot.lane.b32.xlu0 %v441_v7, %s968_s30 }
 0x115   : > { %v353_v3 = vpop.permute.xlu1 %352 }
 0x116   : > { %371 = vst.msk [vmem:[#allocation2 + $0x10] sm:$0xff] %vm358_vm8, %v353_v3  ;;  %v351_v11 = vpop.permute.xlu0 %350 }
 0x117   : > { %v1075_v12 = vsel %vm358_vm8, %v351_v11, %v353_v3  ;;  %368 = vst.msk [vmem:[#allocation2] sm:$0xff] %vm367_vm9, %v351_v11 }
 0x118   : > { %913 = vmatprep.subr.msk.bf16.mxu1 %vm425_vm10, %v1075_v12 }
 0x11b   : > { %v357_v13 = vpop.permute.xlu1 %356  ;;  %v355_v14 = vpop.permute.xlu0 %354 }
 0x11c   : > { %374 = vst.msk [vmem:[#allocation2 + $0x28] sm:$0xff] %vm358_vm8, %v357_v13  ;;  %v1079_v15 = vsel %vm358_vm8, %v355_v14, %v357_v13  ;;  %vm480_vm8 = vcmask 146432  }
 0x11d   : > { %372 = vst.msk [vmem:[#allocation2 + $0x18] sm:$0xff] %vm367_vm9, %v355_v14  ;;  %v1081_v16 = vld [vmem:[#allocation2 + $0x10] sm:$0xff] }
 0x11e   : > { %531 = vrot.lane.b32.xlu1 %v1081_v16, %s969_s7  ;;  %v1084_v17 = vld [vmem:[#allocation2] sm:$0xff] }
 0x11f   : > { %527 = vrot.lane.b32.xlu0 %v1084_v17, %s969_s7  ;;  %v426_v18 = vsel %vm424_vm11, %v1084_v17, 0  ;;  %v449_v22 = vpop.permute.xlu1 %448  ;;  %v447_v23 = vpop.permute.xlu0 %446 }
 0x120   : > { %742 = vmatpush1.bf16.msra.mxu1 %v426_v18  ;;  %vm454_vm12 = vcmp.ne.s16.totalorder %v449_v22, 0  ;;  %vm452_vm13 = vcmp.ne.s16.totalorder %v447_v23, 0  ;;  %v451_v36 = vsel %vm450_vm0, %v447_v23, %v449_v22  ;;  %vm539_vm0 = vcmask 1039360  }
 0x121   : > { %914 = vmatprep.subr.msk.bf16.mxu1 %vm425_vm10, %v1079_v15  ;;  %v457_v24 = vsel %vm454_vm12, %v1081_v16, 0  ;;  %v455_v25 = vsel %vm452_vm13, %v1084_v17, 0  ;;  %vm453_vm3 = vcmp.ne.s16.totalorder %v451_v36, 0 }
 0x122   : > { %v456_v40 = vsel %vm453_vm3, %v1075_v12, 0  ;;  %v459_v43 = vsel %vm453_vm3, %v1079_v15, 0  ;;  %vm614_vm3 = vcmask 908288  }
 0x123   : > { %v1090_v19 = vld [vmem:[#allocation2 + $0x28] sm:$0xff]  ;;  %v464_v26 = vpop.permute.xlu1 %463  ;;  %v462_v27 = vpop.permute.xlu0 %461 }
 0x124   : > { %v1092_v20 = vld [vmem:[#allocation2 + $0x18] sm:$0xff]  ;;  %537 = vrot.lane.b32.xlu0 %v1090_v19, %s969_s7  ;;  %v460_v29 = vsel %vm454_vm12, %v1090_v19, 0  ;;  %vm469_vm14 = vcmp.ne.s16.totalorder %v464_v26, 0  ;;  %vm467_vm15 = vcmp.ne.s16.totalorder %v462_v27, 0  ;;  %v466_v41 = vsel %vm465_vm4, %v462_v27, %v464_v26 }
 0x125   : > { %533 = vrot.lane.b32.xlu1 %v1092_v20, %s969_s7  ;;  %v428_v21 = vsel %vm424_vm11, %v1092_v20, 0  ;;  %v458_v28 = vsel %vm452_vm13, %v1092_v20, 0  ;;  %v472_v30 = vsel %vm469_vm14, %v1081_v16, 0  ;;  %v470_v31 = vsel %vm467_vm15, %v1084_v17, 0 }
 0x126   : > { %744 = vmatpush1.bf16.msra.mxu1 %v428_v21  ;;  %v473_v32 = vsel %vm467_vm15, %v1092_v20, 0  ;;  %v475_v33 = vsel %vm469_vm14, %v1090_v19, 0  ;;  %vm468_vm5 = vcmp.ne.s16.totalorder %v466_v41, 0  ;;  %vm495_vm11 = vcmask 261120  }
 0x127   : > { %v479_v34 = vpop.permute.xlu1 %478  ;;  %v477_v35 = vpop.permute.xlu0 %476  ;;  %v471_v47 = vsel %vm468_vm5, %v1075_v12, 0  ;;  %v474_v48 = vsel %vm468_vm5, %v1079_v15, 0  ;;  %vm510_vm14 = vcmask 277504   ;;  %vm641_vm4 = vcmask 900096  }
 0x128   : > { %602 = vrot.lane.b32.xlu0 %v1084_v17, %s970_s8  ;;  %vm484_vm1 = vcmp.ne.s16.totalorder %v479_v34, 0  ;;  %vm482_vm2 = vcmp.ne.s16.totalorder %v477_v35, 0  ;;  %v481_v52 = vsel %vm480_vm8, %v477_v35, %v479_v34  ;;  %vm668_vm5 = vcmask 785408  }
 0x129   : > { %606 = vrot.lane.b32.xlu1 %v1081_v16, %s970_s8  ;;  %v487_v37 = vsel %vm484_vm1, %v1081_v16, 0  ;;  %v485_v38 = vsel %vm482_vm2, %v1084_v17, 0  ;;  %v488_v39 = vsel %vm482_vm2, %v1092_v20, 0  ;;  %v490_v44 = vsel %vm484_vm1, %v1090_v19, 0 }
 0x12a   : > { %vm483_vm9 = vcmp.ne.s16.totalorder %v481_v52, 0  ;;  %vm566_vm1 = vcmask 1031168   ;;  %vm593_vm2 = vcmask 916480  }
 0x12b   : > { %v494_v42 = vpop.permute.xlu1 %493  ;;  %v492_v45 = vpop.permute.xlu0 %491  ;;  %v486_v55 = vsel %vm483_vm9, %v1075_v12, 0  ;;  %v489_v58 = vsel %vm483_vm9, %v1079_v15, 0 }
 0x12c   : > { %612 = vrot.lane.b32.xlu0 %v1090_v19, %s970_s8  ;;  %vm499_vm6 = vcmp.ne.s16.totalorder %v494_v42, 0  ;;  %vm497_vm7 = vcmp.ne.s16.totalorder %v492_v45, 0  ;;  %v496_v56 = vsel %vm495_vm11, %v492_v45, %v494_v42 }
 0x12d   : > { %608 = vrot.lane.b32.xlu1 %v1092_v20, %s970_s8  ;;  %v502_v46 = vsel %vm499_vm6, %v1081_v16, 0  ;;  %v500_v49 = vsel %vm497_vm7, %v1084_v17, 0  ;;  %v503_v50 = vsel %vm497_vm7, %v1092_v20, 0  ;;  %v505_v51 = vsel %vm499_vm6, %v1090_v19, 0 }
 0x12e   : > { %vm498_vm12 = vcmp.ne.s16.totalorder %v496_v56, 0  ;;  %vm689_vm6 = vcmask 777216   ;;  %vm716_vm7 = vcmask 769024  }
 0x12f   : > { %v509_v53 = vpop.permute.xlu1 %508  ;;  %v507_v57 = vpop.permute.xlu0 %506  ;;  %v501_v59 = vsel %vm498_vm12, %v1075_v12, 0  ;;  %v504_v62 = vsel %vm498_vm12, %v1079_v15, 0 }
 0x130   : > { %529 = vrot.lane.b32.xlu0 %v1075_v12, %s969_s7  ;;  %vm514_vm10 = vcmp.ne.s16.totalorder %v509_v53, 0  ;;  %vm512_vm13 = vcmp.ne.s16.totalorder %v507_v57, 0  ;;  %v511_v61 = vsel %vm510_vm14, %v507_v57, %v509_v53 }
 0x131   : > { %535 = vrot.lane.b32.xlu1 %v1079_v15, %s969_s7  ;;  %v517_v54 = vsel %vm514_vm10, %v1081_v16, 0  ;;  %v515_v60 = vsel %vm512_vm13, %v1084_v17, 0  ;;  %vm513_vm15 = vcmp.ne.s16.totalorder %v511_v61, 0  ;;  %v520_v2 = vsel %vm514_vm10, %v1090_v19, 0 }
 0x132   : > { %v516_v1 = vsel %vm513_vm15, %v1075_v12, 0  ;;  %v519_v4 = vsel %vm513_vm15, %v1079_v15, 0  ;;  %v518_v5 = vsel %vm512_vm13, %v1092_v20, 0 }
 0x134   : > { %554 = vrot.lane.b32.xlu0 %v455_v25, %s971_s9 }
 0x135   : > { %558 = vrot.lane.b32.xlu1 %v457_v24, %s971_s9 }
 0x138   : > { %564 = vrot.lane.b32.xlu0 %v460_v29, %s971_s9 }
 0x139   : > { %560 = vrot.lane.b32.xlu1 %v458_v28, %s971_s9 }
 0x13c   : > { %581 = vrot.lane.b32.xlu0 %v470_v31, %s972_s10 }
 0x13d   : > { %585 = vrot.lane.b32.xlu1 %v472_v30, %s972_s10 }
 0x140   : > { %591 = vrot.lane.b32.xlu0 %v475_v33, %s972_s10 }
 0x141   : > { %587 = vrot.lane.b32.xlu1 %v473_v32, %s972_s10 }
 0x144   : > { %604 = vrot.lane.b32.xlu0 %v1075_v12, %s970_s8 }
 0x145   : > { %610 = vrot.lane.b32.xlu1 %v1079_v15, %s970_s8 }
 0x148   : > { %629 = vrot.lane.b32.xlu0 %v485_v38, %s973_s11 }
 0x149   : > { %633 = vrot.lane.b32.xlu1 %v487_v37, %s973_s11 }
 0x14c   : > { %556 = vrot.lane.b32.xlu0 %v456_v40, %s971_s9 }
 0x14d   : > { %635 = vrot.lane.b32.xlu1 %v488_v39, %s973_s11 }
 0x150   : > { %639 = vrot.lane.b32.xlu0 %v490_v44, %s973_s11 }
 0x151   : > { %562 = vrot.lane.b32.xlu1 %v459_v43, %s971_s9 }
 0x154   : > { %583 = vrot.lane.b32.xlu0 %v471_v47, %s972_s10 }
 0x155   : > { %660 = vrot.lane.b32.xlu1 %v502_v46, %s974_s12 }
 0x158   : > { %656 = vrot.lane.b32.xlu0 %v500_v49, %s974_s12 }
 0x159   : > { %589 = vrot.lane.b32.xlu1 %v474_v48, %s972_s10 }
 0x15c   : > { %666 = vrot.lane.b32.xlu0 %v505_v51, %s974_s12 }
 0x15d   : > { %662 = vrot.lane.b32.xlu1 %v503_v50, %s974_s12 }
 0x160   : > { %679 = vrot.lane.b32.xlu0 %v1075_v12, %s975_s13 }
 0x161   : > { %681 = vrot.lane.b32.xlu1 %v1081_v16, %s975_s13 }
 0x164   : > { %631 = vrot.lane.b32.xlu0 %v486_v55, %s973_s11 }
 0x165   : > { %708 = vrot.lane.b32.xlu1 %v517_v54, %s976_s14 }
 0x168   : > { %677 = vrot.lane.b32.xlu0 %v1084_v17, %s975_s13 }
 0x169   : > { %637 = vrot.lane.b32.xlu1 %v489_v58, %s973_s11 }
 0x16c   : > { %658 = vrot.lane.b32.xlu0 %v501_v59, %s974_s12 }
 0x16d   : > { %704 = vrot.lane.b32.xlu1 %v515_v60, %s976_s14 }
 0x170   : > { %685 = vrot.lane.b32.xlu0 %v1079_v15, %s975_s13 }
 0x171   : > { %664 = vrot.lane.b32.xlu1 %v504_v62, %s974_s12 }
 0x174   : > { %706 = vrot.lane.b32.xlu0 %v516_v1, %s976_s14 }
 0x175   : > { %687 = vrot.lane.b32.xlu1 %v1090_v19, %s975_s13 }
 0x178   : > { %712 = vrot.lane.b32.xlu0 %v519_v4, %s976_s14 }
 0x179   : > { %714 = vrot.lane.b32.xlu1 %v520_v2, %s976_s14 }
 0x17c   : > { %683 = vrot.lane.b32.xlu0 %v1092_v20, %s975_s13 }
 0x17d   : > { %710 = vrot.lane.b32.xlu1 %v518_v5, %s976_s14 }
 0x190   : > { %v532_v6 = vpop.permute.xlu1 %531 }
 0x191   : > { %v528_v7 = vpop.permute.xlu0 %527 }
 0x196   : > { %v538_v9 = vpop.permute.xlu0 %537 }
 0x197   : > { %v534_v8 = vpop.permute.xlu1 %533 }
 0x19a   : > { %v603_v3 = vpop.permute.xlu0 %602 }
 0x19b   : > { %v607_v10 = vpop.permute.xlu1 %606 }
 0x19e   : > { %v613_v12 = vpop.permute.xlu0 %612 }
 0x19f   : > { %v1199_v11 = vpop.permute.xlu1 %608 }
 0x1a2   : > { %v530_v14 = vpop.permute.xlu0 %529 }
 0x1a3   : > { %v536_v13 = vpop.permute.xlu1 %535  ;;  %v541_v15 = vsel %vm539_vm0, %v530_v14, %v532_v6  ;;  %v540_v16 = vsel %vm539_vm0, %v528_v7, %v530_v14 }
 0x1a4   : > { %745 = vmatprep.subr.bf16.mxu1 %v541_v15  ;;  %v543_v17 = vsel %vm539_vm0, %v536_v13, %v538_v9  ;;  %v542_v20 = vsel %vm539_vm0, %v534_v8, %v536_v13 }
 0x1a5   : > { %746 = vmatpush1.bf16.msra.mxu1 %v540_v16 }
 0x1a6   : > { %747 = vmatprep.subr.bf16.mxu1 %v543_v17  ;;  %v555_v19 = vpop.permute.xlu0 %554 }
 0x1a7   : > { %v559_v18 = vpop.permute.xlu1 %558 }
 0x1a9   : > { %748 = vmatpush1.bf16.msra.mxu1 %v542_v20 }
 0x1aa   : > { %v565_v22 = vpop.permute.xlu0 %564 }
 0x1ab   : > { %v561_v21 = vpop.permute.xlu1 %560 }
 0x1ae   : > { %v582_v24 = vpop.permute.xlu0 %581 }
 0x1af   : > { %v586_v23 = vpop.permute.xlu1 %585 }
 0x1b2   : > { %v592_v26 = vpop.permute.xlu0 %591 }
 0x1b3   : > { %v588_v25 = vpop.permute.xlu1 %587 }
 0x1b6   : > { %v605_v28 = vpop.permute.xlu0 %604 }
 0x1b7   : > { %v611_v27 = vpop.permute.xlu1 %610  ;;  %v616_v47 = vsel %vm614_vm3, %v605_v28, %v607_v10  ;;  %v615_v50 = vsel %vm614_vm3, %v603_v3, %v605_v28 }
 0x1b8   : > { %v618_v51 = vsel %vm614_vm3, %v611_v27, %v613_v12  ;;  %v617_v54 = vsel %vm614_vm3, %v1199_v11, %v611_v27 }
 0x1ba   : > { %v630_v30 = vpop.permute.xlu0 %629 }
 0x1bb   : > { %v634_v29 = vpop.permute.xlu1 %633 }
 0x1be   : > { %v557_v32 = vpop.permute.xlu0 %556 }
 0x1bf   : > { %v636_v31 = vpop.permute.xlu1 %635  ;;  %v568_v33 = vsel %vm566_vm1, %v557_v32, %v559_v18  ;;  %v567_v34 = vsel %vm566_vm1, %v555_v19, %v557_v32 }
 0x1c0   : > { %749 = vmatprep.subr.bf16.mxu1 %v568_v33 }
 0x1c1   : > { %750 = vmatpush1.bf16.msra.mxu1 %v567_v34 }
 0x1c2   : > { %v640_v36 = vpop.permute.xlu0 %639 }
 0x1c3   : > { %v563_v35 = vpop.permute.xlu1 %562 }
 0x1c4   : > { %v570_v37 = vsel %vm566_vm1, %v563_v35, %v565_v22  ;;  %v569_v38 = vsel %vm566_vm1, %v561_v21, %v563_v35  ;;  %v910_v22 = vcombine.low %v1181_v63, %v1181_v63 }
 0x1c5   : > { %751 = vmatprep.subr.bf16.mxu1 %v570_v37 }
 0x1c6   : > { %752 = vmatpush1.bf16.msra.mxu1 %v569_v38  ;;  %v584_v40 = vpop.permute.xlu0 %583 }
 0x1c7   : > { %v661_v39 = vpop.permute.xlu1 %660  ;;  %v595_v41 = vsel %vm593_vm2, %v584_v40, %v586_v23  ;;  %v594_v42 = vsel %vm593_vm2, %v582_v24, %v584_v40  ;;  %v951_v23 = vld [vmem:[%s1228_s4 + $0x8] ss:$0 sps:$4 sm:$0xff]   ;;  %v825_v24 = vld [vmem:[%s1023_s28] sm:$0xff] }
 0x1c8   : > { %753 = vmatprep.subr.bf16.mxu1 %v595_v41  ;;  %829 = vst [vmem:[%s1028_s6 + $0x10] sm:$0xf] %v825_v24 }
 0x1ca   : > { %754 = vmatpush1.bf16.msra.mxu1 %v594_v42  ;;  %v657_v44 = vpop.permute.xlu0 %656 }
 0x1cb   : > { %v590_v43 = vpop.permute.xlu1 %589 }
 0x1cc   : > { %v597_v45 = vsel %vm593_vm2, %v590_v43, %v592_v26  ;;  %v596_v46 = vsel %vm593_vm2, %v588_v25, %v590_v43  ;;  %v827_v25 = vcombine.high %v825_v24, %v825_v24 }
 0x1cd   : > { %755 = vmatprep.subr.bf16.mxu1 %v597_v45 }
 0x1ce   : > { %756 = vmatpush1.bf16.msra.mxu1 %v596_v46  ;;  %v667_v49 = vpop.permute.xlu0 %666  ;;  %830 = vst [vmem:[%s1028_s6 + $0x18] sm:$0xf] %v827_v25 }
 0x1cf   : > { %v663_v48 = vpop.permute.xlu1 %662  ;;  %757 = vmatprep.subr.bf16.mxu1 %v616_v47 }
 0x1d2   : > { %758 = vmatpush1.bf16.msra.mxu1 %v615_v50  ;;  %v680_v53 = vpop.permute.xlu0 %679 }
 0x1d3   : > { %v682_v52 = vpop.permute.xlu1 %681  ;;  %759 = vmatprep.subr.bf16.mxu1 %v618_v51 }
 0x1d4   : > { %v691_v9 = vsel %vm689_vm6, %v680_v53, %v682_v52 }
 0x1d6   : > { %760 = vmatpush1.bf16.msra.mxu1 %v617_v54  ;;  %v632_v56 = vpop.permute.xlu0 %631 }
 0x1d7   : > { %v709_v55 = vpop.permute.xlu1 %708  ;;  %v643_v57 = vsel %vm641_vm4, %v632_v56, %v634_v29  ;;  %v642_v58 = vsel %vm641_vm4, %v630_v30, %v632_v56 }
 0x1d8   : > { %761 = vmatprep.subr.bf16.mxu1 %v643_v57 }
 0x1da   : > { %762 = vmatpush1.bf16.msra.mxu1 %v642_v58  ;;  %v678_v60 = vpop.permute.xlu0 %677 }
 0x1db   : > { %v638_v59 = vpop.permute.xlu1 %637  ;;  %v690_v13 = vsel %vm689_vm6, %v678_v60, %v680_v53 }
 0x1dc   : > { %v645_v61 = vsel %vm641_vm4, %v638_v59, %v640_v36  ;;  %v644_v62 = vsel %vm641_vm4, %v636_v31, %v638_v59 }
 0x1dd   : > { %763 = vmatprep.subr.bf16.mxu1 %v645_v61 }
 0x1de   : > { %764 = vmatpush1.bf16.msra.mxu1 %v644_v62  ;;  %v659_v1 = vpop.permute.xlu0 %658 }
 0x1df   : > { %v705_v0 = vpop.permute.xlu1 %704  ;;  %v670_v2 = vsel %vm668_vm5, %v659_v1, %v661_v39  ;;  %v669_v4 = vsel %vm668_vm5, %v657_v44, %v659_v1 }
 0x1e0   : > { %765 = vmatprep.subr.bf16.mxu1 %v670_v2 }
 0x1e2   : > { %766 = vmatpush1.bf16.msra.mxu1 %v669_v4  ;;  %v686_v6 = vpop.permute.xlu0 %685 }
 0x1e3   : > { %v665_v5 = vpop.permute.xlu1 %664 }
 0x1e4   : > { %v672_v7 = vsel %vm668_vm5, %v665_v5, %v667_v49  ;;  %v671_v8 = vsel %vm668_vm5, %v663_v48, %v665_v5 }
 0x1e5   : > { %767 = vmatprep.subr.bf16.mxu1 %v672_v7 }
 0x1e6   : > { %768 = vmatpush1.bf16.msra.mxu1 %v671_v8  ;;  %v707_v3 = vpop.permute.xlu0 %706 }
 0x1e7   : > { %v688_v10 = vpop.permute.xlu1 %687  ;;  %769 = vmatprep.subr.bf16.mxu1 %v691_v9  ;;  %v718_v11 = vsel %vm716_vm7, %v707_v3, %v709_v55  ;;  %v717_v12 = vsel %vm716_vm7, %v705_v0, %v707_v3 }
 0x1e8   : > { %782 = vmatprep.subr.bf16.mxu0 %v718_v11  ;;  %v693_v14 = vsel %vm689_vm6, %v686_v6, %v688_v10 }
 0x1e9   : > { %783 = vmatpush1.bf16.msra.mxu0 %v717_v12 }
 0x1ea   : > { %770 = vmatpush1.bf16.msra.mxu1 %v690_v13  ;;  %v713_v16 = vpop.permute.xlu0 %712 }
 0x1eb   : > { %v715_v15 = vpop.permute.xlu1 %714  ;;  %771 = vmatprep.subr.bf16.mxu1 %v693_v14 }
 0x1ec   : > { %v720_v17 = vsel %vm716_vm7, %v713_v16, %v715_v15 }
 0x1ed   : > { %784 = vmatprep.subr.bf16.mxu0 %v720_v17 }
 0x1ee   : > { %v684_v19 = vpop.permute.xlu0 %683 }
 0x1ef   : > { %v711_v18 = vpop.permute.xlu1 %710  ;;  %v692_v20 = vsel %vm689_vm6, %v684_v19, %v686_v6 }
 0x1f0   : > { %v719_v21 = vsel %vm716_vm7, %v711_v18, %v713_v16  ;;  %772 = vmatpush1.bf16.msra.mxu1 %v692_v20 }
 0x1f1   : > { %785 = vmatpush1.bf16.msra.mxu0 %v719_v21 }
 0x1f3   : > { %774 = vmatmul.mubr.bf16.vlgmr.msra.gmra.mrb[0].mxu1 %v910_v22 }
 0x1f4   : > { %915 = vmatmul.mubr.msk.bf16.vlgmr.msra.gmra.mrb[0].mxu0 %vm495_vm11, %v951_v23 }
 0x2c6   : > { %v775_v26 = vpop.f32.mrb[0].mxu1 }
 0x2c7   : > { %v816_v27 = vpop.f32.mrb[0].mxu0  ;;  %v777_v29 = vpop.f32.mrb[1].mxu1 }
 0x2c8   : > { %v817_v28 = vadd.f32 %v816_v27, %v775_v26  ;;  %v818_v63 = vpop.f32.mrb[1].mxu0  ;;  %v779_v31 = vpop.f32.mrb[2].mxu1 }
 0x2c9   : > { %v819_v30 = vadd.f32 %v818_v63, %v777_v29  ;;  %v820_v32 = vpop.f32.mrb[2].mxu0  ;;  %v780_v33 = vpop.f32.mrb[3].mxu1 }
 0x2ca   : > { %823 = vst [vmem:[%s1028_s6] sm:$0xff] %v817_v28  ;;  %v821_v34 = vpop.f32.mrb[3].mxu0 }
 0x2cb   : > { %824 = vst [vmem:[%s1028_s6 + $0x8] sm:$0xff] %v819_v30 }
 0x2cc PF: > { %s15_s18 = sadd.s32 1, %s959_s18  }
 0x2cd   : > { %p12_p5 = scmp.ge.s32.totalorder %s15_s18, 4  }
 0x2cf   :  { %14 = sbr.rel (!%p12_p5) target bundleno = 1 (0x1), region = 77 }

</bundles_post_ra>
